<compile_context>
chip_gen: v5e
topology: v5e:2x2
jax: 0.10.0
libtpu: 0.0.40
codegen_flags: <defaults>
</compile_context>

<pallas_src>
import functools

import jax
import jax.numpy as jnp
from jax.experimental import pallas as pl
from jax.experimental.pallas import tpu as pltpu

D = 256  # fixed by nn.Linear(256, 256)


def _attention_kernel(x_ref, wt_ref, b_ref, o_ref, *, matmul_dtype):
    f32 = jnp.float32
    block_b, T, _ = x_ref.shape

    wt = wt_ref[...]                  # (D, D) == W.T, matmul_dtype
    bias = b_ref[...]                 # (1, D) f32

    # (T, T) identity, used to fold the residual h^T into the context matmul:
    #   out^T = h^T + h^T @ p = h^T @ (p + I)
    rows = jax.lax.broadcasted_iota(jnp.int32, (T, T), 0)
    cols = jax.lax.broadcasted_iota(jnp.int32, (T, T), 1)
    eye = (rows == cols).astype(f32)

    def body(bb, carry):
        xb = x_ref[bb].astype(f32)                    # (T, 2D) leading-dim load
        hb = xb[:, :D] + xb[:, D:]                    # (T, D) f32
        hc = hb.astype(matmul_dtype)

        # Linear(256, 256) + ReLU.
        aw = jnp.dot(hc, wt, preferred_element_type=f32) + bias
        aw = jnp.maximum(aw, 0.0)                     # (T, D) f32
        mc = jnp.tanh(hb).astype(matmul_dtype)        # (T, D)

        # s[q, k] = m[q, :] . aw[k, :]   (== bmm(m, aw^T), no transpose op)
        s = jax.lax.dot_general(
            mc, aw.astype(matmul_dtype),
            (((1,), (1,)), ((), ())),
            preferred_element_type=f32)               # (T, T)

        # Softmax over keys (last dim): EUP reciprocal instead of VALU divide.
        s = jnp.exp(s - jnp.max(s, axis=-1, keepdims=True))
        p = s * pl.reciprocal(jnp.sum(s, axis=-1, keepdims=True), approx=True)

        # out^T[d, k] = sum_q h[q, d] * (p + I)[q, k]  == h^T + h^T @ p
        p_plus = (p + eye).astype(matmul_dtype)
        out_dt = jax.lax.dot_general(
            hc, p_plus, (((0,), (0,)), ((), ())),
            preferred_element_type=f32)               # (D, T) — PyTorch layout

        o_ref[bb] = out_dt.astype(o_ref.dtype)
        return carry

    jax.lax.fori_loop(0, block_b, body, 0)


def _num_parallel_tensorcores():
    """How many TensorCores one Pallas 'parallel' grid axis is sharded over."""
    try:
        kind = jax.devices()[0].device_kind.lower()
    except Exception:
        return 1
    if "v7" in kind or "7x" in kind or "v5p" in kind or "v4" in kind:
        return 2
    return 1


def _pick_block_b(B, max_bb=16, min_grid=1):
    """Largest divisor of B <= max_bb, keeping >= min_grid grid steps if possible."""
    divisors = [d for d in range(1, min(B, max_bb) + 1) if B % d == 0]
    best = max(divisors)
    if min_grid > 1 and B // best < min_grid:
        smaller = [d for d in divisors if B // d >= min_grid]
        if smaller:
            best = max(smaller)   # keep both TensorCores busy on multi-TC chips
    return best


def attention_layer(x, w, b, *, matmul_dtype=jnp.bfloat16, block_b=None,
                    max_bb=16):
    """x: (B, T, 2*D); w: (D, D) PyTorch Linear weight; b: (D,).

    Returns (B, D, T) in x.dtype, matching the PyTorch module output layout."""
    B, T, F = x.shape
    assert F == 2 * D, f"expected last dim {2 * D}, got {F}"
    if block_b is None:
        block_b = _pick_block_b(B, max_bb=max_bb,
                                min_grid=_num_parallel_tensorcores())
    assert B % block_b == 0, (B, block_b)

    wt = w.T.astype(matmul_dtype)                    # pre-transpose + pre-cast
    b2 = b.reshape(1, D).astype(jnp.float32)

    kernel = functools.partial(_attention_kernel, matmul_dtype=matmul_dtype)

    io_bytes = x.dtype.itemsize
    w_bytes = jnp.dtype(matmul_dtype).itemsize
    cost = pl.CostEstimate(
        flops=2 * B * T * D * (D + 2 * T),
        transcendentals=B * T * (D + T + 1),
        bytes_accessed=(B * T * 2 * D * io_bytes + B * D * T * io_bytes
                        + D * D * w_bytes + D * 4),
    )

    return pl.pallas_call(
        kernel,
        # Lane dim of the output block is T (masked stores for T < 128), which
        # is cheaper than a separate whole-output transpose round-trip in HBM.
        out_shape=jax.ShapeDtypeStruct((B, D, T), x.dtype),
        grid_spec=pltpu.PrefetchScalarGridSpec(
            num_scalar_prefetch=0,
            grid=(B // block_b,),
            in_specs=[
                pl.BlockSpec((block_b, T, 2 * D), lambda i: (i, 0, 0)),
                pl.BlockSpec((D, D), lambda i: (0, 0)),
                pl.BlockSpec((1, D), lambda i: (0, 0)),
            ],
            out_specs=pl.BlockSpec((block_b, D, T), lambda i: (i, 0, 0)),
        ),
        compiler_params=pltpu.CompilerParams(
            dimension_semantics=("parallel",),
            vmem_limit_bytes=32 * 1024 * 1024,
        ),
        cost_estimate=cost,
    )(x, wt, b2)


def _reference(x, w, b):
    """Pure-JAX f32 reference with the exact PyTorch module semantics."""
    f32 = jnp.float32
    x = x.astype(f32)
    h = x[..., :D] + x[..., D:]                                   # (B, T, D)
    aw = jnp.maximum(jnp.einsum("btd,ed->bte", h, w.astype(f32)) + b, 0.0)
    m = jnp.tanh(h)
    s = jnp.einsum("bqd,bkd->bqk", m, aw)                         # (B, T, T)
    p = jax.nn.softmax(s, axis=-1)
    ctx = jnp.einsum("bqd,bqk->bdk", h, p)                        # (B, D, T)
    return jnp.swapaxes(h, 1, 2) + ctx                            # (B, D, T)


if __name__ == "__main__":
    key = jax.random.PRNGKey(0)
    kx1, kx2, kw, kb = jax.random.split(key, 4)

    # PyTorch Linear default init: U(-1/sqrt(D), 1/sqrt(D))
    bound = 1.0 / (D ** 0.5)
    w = jax.random.uniform(kw, (D, D), jnp.float32, -bound, bound)
    b = jax.random.uniform(kb, (D,), jnp.float32, -bound, bound)

    def check(B, T, kxa, tol_f32, tol_bf16):
        x = 0.5 * jax.random.normal(kxa, (B, T, 2 * D), dtype=jnp.float32)
        ref = _reference(x, w, b)

        # Exact f32 MXU path vs the true f32 module semantics (only diff:
        # approximate EUP reciprocal in the softmax denominator).
        out_f32 = jax.block_until_ready(
            attention_layer(x, w, b, matmul_dtype=jnp.float32))
        assert out_f32.shape == (B, D, T), out_f32.shape
        err = float(jnp.max(jnp.abs(out_f32 - ref)))
        assert err < tol_f32, f"f32 path (B={B}, T={T}): max abs err {err}"

        # Default bf16-operand path vs the true f32 module (loose tolerance:
        # bf16 operand rounding in the three matmuls).
        out_bf16 = jax.block_until_ready(attention_layer(x, w, b))
        assert out_bf16.shape == (B, D, T), out_bf16.shape
        err = float(jnp.max(jnp.abs(out_bf16 - ref)))
        assert err < tol_bf16, f"bf16 path (B={B}, T={T}): max abs err {err}"

    # Small aligned shape.
    check(B=4, T=8, kxa=kx1, tol_f32=2e-2, tol_bf16=2e-1)
    # Production-like LipNet length (T=75, not a multiple of 8) exercises the
    # padded-sublane scores/softmax and masked-lane (D, T) output stores.
    check(B=4, T=75, kxa=kx2, tol_f32=2e-2, tol_bf16=2e-1)

    print("KERNEL_OK")
</pallas_src>

<mosaic_0001>
module attributes {stable_mosaic.version = 11 : i64} {
  func.func @_attention_kernel(%arg0: i32, %arg1: memref<4x8x512xf32, #tpu.memory_space<vmem>>, %arg2: memref<256x256xf32, #tpu.memory_space<vmem>>, %arg3: memref<1x256xf32, #tpu.memory_space<vmem>>, %arg4: memref<4x256x8xf32, #tpu.memory_space<vmem>>) attributes {dimension_semantics = [#tpu.dimension_semantics<parallel>], iteration_bounds = array<i64: 1>, scalar_prefetch = 0 : i64, scratch_operands = 0 : i64, tpu.core_type = #tpu.core_type<tc>, window_params = [{transform_indices = @transform_0, window_bounds = array<i64: 4, 8, 512>}, {pipeline_mode = #tpu.pipeline_mode<synchronous>, transform_indices = @transform_1, window_bounds = array<i64: 256, 256>}, {pipeline_mode = #tpu.pipeline_mode<synchronous>, transform_indices = @transform_2, window_bounds = array<i64: 1, 256>}, {transform_indices = @transform_3, window_bounds = array<i64: 4, 256, 8>}]} {
    %c0 = arith.constant 0 : index
    %c0_0 = arith.constant 0 : index
    %0 = vector.load %arg2[%c0, %c0_0] : memref<256x256xf32, #tpu.memory_space<vmem>>, vector<256x256xf32>
    %c0_1 = arith.constant 0 : index
    %c0_2 = arith.constant 0 : index
    %1 = vector.load %arg3[%c0_1, %c0_2] : memref<1x256xf32, #tpu.memory_space<vmem>>, vector<1x256xf32>
    %2 = tpu.iota {dimensions = array<i32: 0>} : vector<8x8xi32>
    %3 = tpu.iota {dimensions = array<i32: 1>} : vector<8x8xi32>
    %4 = arith.cmpi eq, %2, %3 : vector<8x8xi32>
    %5 = arith.extui %4 : vector<8x8xi1> to vector<8x8xi32>
    %6 = arith.sitofp %5 : vector<8x8xi32> to vector<8x8xf32>
    %c0_i32 = arith.constant 0 : i32
    %c4_i32 = arith.constant 4 : i32
    %7 = arith.addi %c0_i32, %c4_i32 : i32
    %c1_i32 = arith.constant 1 : i32
    scf.for %arg5 = %c0_i32 to %7 step %c1_i32  : i32 {
      %8 = arith.index_cast %arg5 : i32 to index
      %c0_4 = arith.constant 0 : index
      %c0_5 = arith.constant 0 : index
      %9 = vector.load %arg1[%8, %c0_4, %c0_5] : memref<4x8x512xf32, #tpu.memory_space<vmem>>, vector<1x8x512xf32>
      %10 = vector.shape_cast %9 : vector<1x8x512xf32> to vector<8x512xf32>
      %11 = vector.extract_strided_slice %10 {offsets = [0, 0], sizes = [8, 256], strides = [1, 1]} : vector<8x512xf32> to vector<8x256xf32>
      %12 = vector.extract_strided_slice %10 {offsets = [0, 256], sizes = [8, 256], strides = [1, 1]} : vector<8x512xf32> to vector<8x256xf32>
      %13 = arith.addf %11, %12 : vector<8x256xf32>
      %cst = arith.constant dense<0.000000e+00> : vector<8x256xf32>
      %14 = tpu.matmul %13, %0, %cst {dimension_numbers = #tpu.dot_dimension_numbers<[1], [0], [0], [1], [0, 0, 1, 1], [], []>} : vector<8x256xf32>, vector<256x256xf32>, vector<8x256xf32> -> vector<8x256xf32>
      %15 = vector.broadcast %1 : vector<1x256xf32> to vector<8x256xf32>
      %16 = arith.addf %14, %15 : vector<8x256xf32>
      %cst_6 = arith.constant 0.000000e+00 : f32
      %17 = vector.broadcast %cst_6 : f32 to vector<8x256xf32>
      %18 = arith.maximumf %16, %17 : vector<8x256xf32>
      %19 = math.tanh %13 : vector<8x256xf32>
      %cst_7 = arith.constant dense<0.000000e+00> : vector<8x8xf32>
      %20 = tpu.matmul %19, %18, %cst_7 {dimension_numbers = #tpu.dot_dimension_numbers<[1], [1], [0], [0], [0, 0, 1, 0], [], []>} : vector<8x256xf32>, vector<8x256xf32>, vector<8x8xf32> -> vector<8x8xf32>
      %cst_8 = arith.constant dense<0xFF800000> : vector<8xf32>
      %21 = vector.multi_reduction <maximumf>, %20, %cst_8 [1] : vector<8x8xf32> to vector<8xf32>
      %22 = vector.shape_cast %21 : vector<8xf32> to vector<8x1xf32>
      %23 = vector.broadcast %22 : vector<8x1xf32> to vector<8x8xf32>
      %24 = arith.subf %20, %23 : vector<8x8xf32>
      %25 = math.exp %24 : vector<8x8xf32>
      %cst_9 = arith.constant dense<0.000000e+00> : vector<8xf32>
      %26 = vector.multi_reduction <add>, %25, %cst_9 [1] : vector<8x8xf32> to vector<8xf32>
      %27 = vector.shape_cast %26 : vector<8xf32> to vector<8x1xf32>
      %28 = tpu.reciprocal %27 {approx = true} : vector<8x1xf32> -> vector<8x1xf32>
      %29 = vector.broadcast %28 : vector<8x1xf32> to vector<8x8xf32>
      %30 = arith.mulf %25, %29 : vector<8x8xf32>
      %31 = arith.addf %30, %6 : vector<8x8xf32>
      %cst_10 = arith.constant dense<0.000000e+00> : vector<256x8xf32>
      %32 = tpu.matmul %13, %31, %cst_10 {dimension_numbers = #tpu.dot_dimension_numbers<[0], [0], [1], [1], [0, 1, 1, 1], [], []>} : vector<8x256xf32>, vector<8x8xf32>, vector<256x8xf32> -> vector<256x8xf32>
      %33 = arith.index_cast %arg5 : i32 to index
      %c0_11 = arith.constant 0 : index
      %c0_12 = arith.constant 0 : index
      %34 = vector.load %arg4[%33, %c0_11, %c0_12] : memref<4x256x8xf32, #tpu.memory_space<vmem>>, vector<1x256x8xf32>
      %35 = vector.shape_cast %34 : vector<1x256x8xf32> to vector<256x8xf32>
      %36 = vector.shape_cast %32 : vector<256x8xf32> to vector<1x256x8xf32>
      tpu.vector_store %arg4[%33, %c0_11, %c0_12], %36 {strides = array<i32>} : memref<4x256x8xf32, #tpu.memory_space<vmem>>, vector<1x256x8xf32>,
    }
    %c4_i32_3 = arith.constant 4 : i32
    return
  }
  func.func @transform_0(%arg0: i32) -> (i32, i32, i32) {
    %c0_i32 = arith.constant 0 : i32
    %c0_i32_0 = arith.constant 0 : i32
    %c0_i32_1 = arith.constant 0 : i32
    return %arg0, %c0_i32, %c0_i32_0 : i32, i32, i32
  }
  func.func @transform_1(%arg0: i32) -> (i32, i32) {
    %c0_i32 = arith.constant 0 : i32
    %c0_i32_0 = arith.constant 0 : i32
    %c0_i32_1 = arith.constant 0 : i32
    return %c0_i32, %c0_i32_0 : i32, i32
  }
  func.func @transform_2(%arg0: i32) -> (i32, i32) {
    %c0_i32 = arith.constant 0 : i32
    %c0_i32_0 = arith.constant 0 : i32
    %c0_i32_1 = arith.constant 0 : i32
    return %c0_i32, %c0_i32_0 : i32, i32
  }
  func.func @transform_3(%arg0: i32) -> (i32, i32, i32) {
    %c0_i32 = arith.constant 0 : i32
    %c0_i32_0 = arith.constant 0 : i32
    %c0_i32_1 = arith.constant 0 : i32
    return %arg0, %c0_i32, %c0_i32_0 : i32, i32, i32
  }
}

</mosaic_0001>

<bundles_post_ra>
// kernel: tpu_custom_call.1
= control target key start
LH: loop header
LB: loop body
LE: loop exit
PB: predicated region body
PF: predicated region fallthrough
CT: control target
= control target key end

     0   :  { %8 = vsyncpa [#allocation3], 0  ;;  %s1108_s0 = inlined_call_operand.hbm [shape: f32[4,8,512], index: 0, kind: input, shape index: {}]   ;;  %s1109_s1 = inlined_call_operand.hbm [shape: f32[256,256], index: 1, kind: input, shape index: {}]   ;;  %s1110_s2 = inlined_call_operand.hbm [shape: f32[1,256], index: 2, kind: input, shape index: {}]   ;;  %s1111_s3 = inlined_call_operand.vmem [shape: f32[4,256,8], index: 3, kind: output, shape index: {}]  }
   0x1   :  { %9 = vsyncpa [#allocation5], 0  ;;  %s27_s14 = sshll.u32 %s1109_s1, 4  ;;  %s759_s15 = smov [#allocation4]   ;;  %s28_s14 = int_to_ptr.hbm [resolvable:$true] %s27_s14 }
   0x2   :  { %s29_s16 = sshll.u32 %s759_s15, 4  ;;  %s14_s19 = sshll.u32 %s1108_s0, 4  ;;  %s30_s16 = int_to_ptr.vmem [resolvable:$true] %s29_s16  ;;  %s15_s19 = int_to_ptr.hbm [resolvable:$true] %s14_s19 }
   0x3   :  { %s760_s20 = smov 256   ;;  %s761_s21 = smov 16  }
   0x4   :  { %35 = dma.hbm_to_vmem [thread:$0]  %s28_s14, 8192, %s30_s16, [#allocation5], %s760_s20, %s760_s20, %s761_s21  }
   0x5   :  { %s762_s22 = smov [#allocation2]   ;;  %s763_s24 = smov 512  }
   0x6   :  { %s16_s23 = sshll.u32 %s762_s22, 4  ;;  %s764_s25 = smov 32   ;;  %s17_s23 = int_to_ptr.vmem [resolvable:$true] %s16_s23 }
   0x7   :  { %22 = dma.hbm_to_vmem [thread:$0]  %s15_s19, 2048, %s17_s23, [#allocation3], %s763_s24, %s763_s24, %s764_s25  }
   0x8   :  { %s41_s27 = sshll.u32 %s1110_s2, 4  ;;  %s765_s28 = smov [#allocation6]   ;;  %s42_s27 = int_to_ptr.hbm [resolvable:$true] %s41_s27 }
   0x9   :  { %s43_s29 = sshll.u32 %s765_s28, 4  ;;  %s44_s29 = int_to_ptr.vmem [resolvable:$true] %s43_s29 }
   0xa   :  { %46 = dma.hbm_to_vmem [thread:$0]  %s42_s27, 32, %s44_s29, [#allocation5]  }
   0xb   :  { %751 = dma.done.wait [#allocation3], 2048  }
   0xc   :  { %752 = vsyncadd [#allocation3], 4294965248 }
   0xd   :  { %753 = dma.done.wait [#allocation5], 8224  }
   0xe   :  { %754 = vsyncadd [#allocation5], 4294959072  ;;  %v124_v0 = vlaneseq  ;;  %v766_v3 = vmov 0.0   ;;  %v798_v5 = vld [vmem:[#allocation4] sm:$0xff]  ;;  %v800_v6 = vld [vmem:[#allocation4 + $0x8] sm:$0xff]  ;;  %s928_s0 = smov 0  }
   0xf   :  { %1113 = vst [vmem:[#allocation10_spill] sm:$0xff] %v798_v5  ;;  %v802_v7 = vld [vmem:[#allocation4 + $0x10] sm:$0xff]  ;;  %v804_v8 = vld [vmem:[#allocation4 + $0x18] sm:$0xff]  ;;  %v806_v9 = vld [vmem:[#allocation4 + $0x20] sm:$0xff] }
  0x10   :  { %v125_v1 = vshrl.u32 %v124_v0, 7  ;;  %v127_v2 = vand.u32 127, %v124_v0  ;;  %1114 = vst [vmem:[#allocation11_spill] sm:$0xff] %v800_v6  ;;  %v808_v10 = vld [vmem:[#allocation4 + $0x28] sm:$0xff]  ;;  %v810_v11 = vld [vmem:[#allocation4 + $0x30] sm:$0xff]  ;;  %v812_v12 = vld [vmem:[#allocation4 + $0x38] sm:$0xff] }
  0x11   :  { %1115 = vst [vmem:[#allocation12_spill] sm:$0xff] %v802_v7  ;;  %v814_v13 = vld [vmem:[#allocation4 + $0x40] sm:$0xff]  ;;  %v816_v14 = vld [vmem:[#allocation4 + $0x48] sm:$0xff]  ;;  %v818_v15 = vld [vmem:[#allocation4 + $0x50] sm:$0xff] }
  0x12   :  { %vm128_vm0 = vcmp.eq.s32.totalorder %v125_v1, %v127_v2  ;;  %1116 = vst [vmem:[#allocation13_spill] sm:$0xff] %v804_v8  ;;  %v820_v16 = vld [vmem:[#allocation4 + $0x58] sm:$0xff]  ;;  %v822_v17 = vld [vmem:[#allocation4 + $0x60] sm:$0xff]  ;;  %v824_v18 = vld [vmem:[#allocation4 + $0x68] sm:$0xff] }
  0x13   :  { %v796_v4 = vsel %vm128_vm0, 1.0, %v766_v3  ;;  %1117 = vst [vmem:[#allocation14_spill] sm:$0xff] %v806_v9  ;;  %v826_v19 = vld [vmem:[#allocation4 + $0x70] sm:$0xff]  ;;  %v828_v20 = vld [vmem:[#allocation4 + $0x78] sm:$0xff]  ;;  %v830_v21 = vld [vmem:[#allocation4 + $0x80] sm:$0xff] }
  0x14   :  { %1112 = vst [vmem:[#allocation9_spill] sm:$0xff] %v796_v4  ;;  %v832_v22 = vld [vmem:[#allocation4 + $0x88] sm:$0xff]  ;;  %v834_v23 = vld [vmem:[#allocation4 + $0x90] sm:$0xff]  ;;  %v836_v24 = vld [vmem:[#allocation4 + $0x98] sm:$0xff] }
  0x15   :  { %1118 = vst [vmem:[#allocation15_spill] sm:$0xff] %v808_v10  ;;  %v838_v25 = vld [vmem:[#allocation4 + $0xa0] sm:$0xff]  ;;  %v840_v26 = vld [vmem:[#allocation4 + $0xa8] sm:$0xff]  ;;  %v842_v27 = vld [vmem:[#allocation4 + $0xb0] sm:$0xff] }
  0x16   :  { %1119 = vst [vmem:[#allocation16_spill] sm:$0xff] %v810_v11  ;;  %v844_v28 = vld [vmem:[#allocation4 + $0xb8] sm:$0xff]  ;;  %v846_v29 = vld [vmem:[#allocation4 + $0xc0] sm:$0xff]  ;;  %v848_v30 = vld [vmem:[#allocation4 + $0xc8] sm:$0xff] }
  0x17   :  { %1120 = vst [vmem:[#allocation17_spill] sm:$0xff] %v812_v12  ;;  %v850_v31 = vld [vmem:[#allocation4 + $0xd0] sm:$0xff]  ;;  %v852_v32 = vld [vmem:[#allocation4 + $0xd8] sm:$0xff]  ;;  %v854_v33 = vld [vmem:[#allocation4 + $0xe0] sm:$0xff] }
  0x18   :  { %1121 = vst [vmem:[#allocation18_spill] sm:$0xff] %v814_v13  ;;  %v856_v34 = vld [vmem:[#allocation4 + $0xe8] sm:$0xff]  ;;  %v858_v35 = vld [vmem:[#allocation4 + $0xf0] sm:$0xff]  ;;  %v860_v36 = vld [vmem:[#allocation4 + $0xf8] sm:$0xff] }
  0x19   :  { %1122 = vst [vmem:[#allocation19_spill] sm:$0xff] %v816_v14  ;;  %v862_v37 = vld [vmem:[#allocation4 + $0x100] sm:$0xff]  ;;  %v864_v38 = vld [vmem:[#allocation4 + $0x108] sm:$0xff]  ;;  %v866_v39 = vld [vmem:[#allocation4 + $0x110] sm:$0xff] }
  0x1a   :  { %1123 = vst [vmem:[#allocation20_spill] sm:$0xff] %v818_v15  ;;  %v868_v40 = vld [vmem:[#allocation4 + $0x118] sm:$0xff]  ;;  %v870_v41 = vld [vmem:[#allocation4 + $0x120] sm:$0xff]  ;;  %v872_v42 = vld [vmem:[#allocation4 + $0x128] sm:$0xff] }
  0x1b   :  { %1124 = vst [vmem:[#allocation21_spill] sm:$0xff] %v820_v16  ;;  %v874_v43 = vld [vmem:[#allocation4 + $0x130] sm:$0xff]  ;;  %v876_v44 = vld [vmem:[#allocation4 + $0x138] sm:$0xff]  ;;  %v878_v45 = vld [vmem:[#allocation4 + $0x140] sm:$0xff] }
  0x1c   :  { %1125 = vst [vmem:[#allocation22_spill] sm:$0xff] %v822_v17  ;;  %v880_v46 = vld [vmem:[#allocation4 + $0x148] sm:$0xff]  ;;  %v882_v47 = vld [vmem:[#allocation4 + $0x150] sm:$0xff]  ;;  %v884_v48 = vld [vmem:[#allocation4 + $0x158] sm:$0xff] }
  0x1d   :  { %1126 = vst [vmem:[#allocation23_spill] sm:$0xff] %v864_v38  ;;  %v886_v49 = vld [vmem:[#allocation4 + $0x160] sm:$0xff]  ;;  %v888_v50 = vld [vmem:[#allocation4 + $0x168] sm:$0xff]  ;;  %v890_v51 = vld [vmem:[#allocation4 + $0x170] sm:$0xff] }
  0x1e   :  { %v892_v52 = vld [vmem:[#allocation4 + $0x178] sm:$0xff]  ;;  %v894_v53 = vld [vmem:[#allocation4 + $0x180] sm:$0xff]  ;;  %v896_v54 = vld [vmem:[#allocation4 + $0x188] sm:$0xff] }
  0x1f   :  { %v898_v55 = vld [vmem:[#allocation4 + $0x190] sm:$0xff]  ;;  %v900_v56 = vld [vmem:[#allocation4 + $0x198] sm:$0xff]  ;;  %v902_v57 = vld [vmem:[#allocation4 + $0x1a0] sm:$0xff] }
  0x20   :  { %v904_v58 = vld [vmem:[#allocation4 + $0x1a8] sm:$0xff]  ;;  %v906_v59 = vld [vmem:[#allocation4 + $0x1b0] sm:$0xff]  ;;  %v908_v60 = vld [vmem:[#allocation4 + $0x1b8] sm:$0xff] }
  0x21   :  { %v910_v61 = vld [vmem:[#allocation4 + $0x1c0] sm:$0xff]  ;;  %v912_v62 = vld [vmem:[#allocation4 + $0x1c8] sm:$0xff]  ;;  %v914_v63 = vld [vmem:[#allocation4 + $0x1d0] sm:$0xff] }
  0x22   :  { %v916_v0 = vld [vmem:[#allocation4 + $0x1d8] sm:$0xff]  ;;  %v918_v1 = vld [vmem:[#allocation4 + $0x1e0] sm:$0xff]  ;;  %v920_v2 = vld [vmem:[#allocation4 + $0x1e8] sm:$0xff] }
  0x23   :  { %1127 = vst [vmem:[#allocation24_spill] sm:$0xff] %v916_v0  ;;  %v922_v3 = vld [vmem:[#allocation4 + $0x1f0] sm:$0xff]  ;;  %v924_v4 = vld [vmem:[#allocation4 + $0x1f8] sm:$0xff]  ;;  %v926_v38 = vld [vmem:[#allocation6] sm:$0x3] }
  0x24   :  { %1128 = vst [vmem:[#allocation25_spill] sm:$0xff] %v918_v1 }
  0x25   :  { %1129 = vst [vmem:[#allocation26_spill] sm:$0xff] %v920_v2 }
  0x26   :  { %1130 = vst [vmem:[#allocation27_spill] sm:$0xff] %v922_v3 }
  0x27   :  { %1131 = vst [vmem:[#allocation28_spill] sm:$0xff] %v924_v4 }
  0x28 LB: > { %151 = vmatpush.msra.mxu0 %v858_v35  ;;  %191 = vmatpush.msra.mxu2 %v860_v36  ;;  %v1137_v17 = vld [vmem:[#allocation22_spill] sm:$0xff]  ;;  %s646_s2 = sshll.u32 %s757_s0, 5  ;;  %v1138_v15 = vld [vmem:[#allocation20_spill] sm:$0xff]  ;;  %v1139_v16 = vld [vmem:[#allocation21_spill] sm:$0xff]  ;;  %vm275_vm1 = vcmask 64512   ;;  %s645_s4 = sshll.u32 %s757_s0, 8  ;;  %s757_s0 = sphi %s928_s0, %s136_s0  }
  0x29   : > { %v1140_v13 = vld [vmem:[#allocation18_spill] sm:$0xff]  ;;  %v1141_v14 = vld [vmem:[#allocation19_spill] sm:$0xff]  ;;  %v1142_v11 = vld [vmem:[#allocation16_spill] sm:$0xff]  ;;  %s139_s30 = scalar_lea.vmem [#allocation2], %s646_s2  ;;  %s1027_s7 = scalar_lea.vmem %s1111_s3, %s645_s4 }
  0x2a   : > { %152 = vmatpush.msra.mxu0 %v854_v33  ;;  %192 = vmatpush.msra.mxu2 %v856_v34  ;;  %v1136_v0 = vld [vmem:[#allocation24_spill] sm:$0xff]  ;;  %v1143_v12 = vld [vmem:[#allocation17_spill] sm:$0xff]  ;;  %v1144_v9 = vld [vmem:[#allocation14_spill] sm:$0xff]  ;;  %s136_s0 = sadd.s32 1, %s757_s0  }
  0x2b   : > { %v1134_v1 = vld [vmem:[#allocation25_spill] sm:$0xff]  ;;  %v1145_v10 = vld [vmem:[#allocation15_spill] sm:$0xff]  ;;  %v1146_v7 = vld [vmem:[#allocation12_spill] sm:$0xff]  ;;  %p133_p0 = scmp.ge.s32.totalorder %s136_s0, 4  }
  0x2c   : > { %v1135_v2 = vld [vmem:[#allocation26_spill] sm:$0xff]  ;;  %153 = vmatpush.msra.mxu0 %v850_v31  ;;  %193 = vmatpush.msra.mxu2 %v852_v32  ;;  %v1147_v8 = vld [vmem:[#allocation13_spill] sm:$0xff]  ;;  %v1149_v6 = vld [vmem:[#allocation11_spill] sm:$0xff] }
  0x2d   : > { %v1132_v3 = vld [vmem:[#allocation27_spill] sm:$0xff]  ;;  %v1148_v5 = vld [vmem:[#allocation10_spill] sm:$0xff] }
  0x2e   : > { %171 = vmatpush.msra.mxu1 %v1132_v3  ;;  %v1133_v4 = vld [vmem:[#allocation28_spill] sm:$0xff]  ;;  %154 = vmatpush.msra.mxu0 %v846_v29 }
  0x2f   : > { %211 = vmatpush.msra.mxu3 %v1133_v4  ;;  %194 = vmatpush.msra.mxu2 %v848_v30  ;;  %v143_v3 = vld [vmem:[%s139_s30 + $0x18] sm:$0xff] }
  0x30   : > { %172 = vmatpush.msra.mxu1 %v1134_v1  ;;  %155 = vmatpush.msra.mxu0 %v842_v27  ;;  %v142_v1 = vld [vmem:[%s139_s30 + $0x10] sm:$0xff] }
  0x31   : > { %212 = vmatpush.msra.mxu3 %v1135_v2  ;;  %195 = vmatpush.msra.mxu2 %v844_v28  ;;  %v141_v2 = vld [vmem:[%s139_s30 + $0x8] sm:$0xff] }
  0x32   : > { %173 = vmatpush.msra.mxu1 %v914_v63  ;;  %156 = vmatpush.msra.mxu0 %v838_v25 }
  0x33   : > { %213 = vmatpush.msra.mxu3 %v1136_v0  ;;  %196 = vmatpush.msra.mxu2 %v840_v26  ;;  %v140_v0 = vld [vmem:[%s139_s30] sm:$0xff] }
  0x34   : > { %174 = vmatpush.msra.mxu1 %v910_v61  ;;  %157 = vmatpush.msra.mxu0 %v834_v23  ;;  %v144_v4 = vadd.f32 %v142_v1, %v140_v0  ;;  %v147_v0 = vperm.slane %v926_v38, 0 }
  0x35   : > { %214 = vmatpush.msra.mxu3 %v912_v62  ;;  %197 = vmatpush.msra.mxu2 %v836_v24 }
  0x36   : > { %175 = vmatpush.msra.mxu1 %v906_v59  ;;  %158 = vmatpush.msra.mxu0 %v830_v21  ;;  %667 = vtanh.f32 %v144_v4 }
  0x37   : > { %215 = vmatpush.msra.mxu3 %v908_v60  ;;  %198 = vmatpush.msra.mxu2 %v832_v22 }
  0x38   : > { %176 = vmatpush.msra.mxu1 %v902_v57  ;;  %159 = vmatpush.msra.mxu0 %v826_v19 }
  0x39   : > { %216 = vmatpush.msra.mxu3 %v904_v58  ;;  %199 = vmatpush.msra.mxu2 %v828_v20 }
  0x3a   : > { %177 = vmatpush.msra.mxu1 %v898_v55  ;;  %160 = vmatpush.msra.mxu0 %v1137_v17 }
  0x3b   : > { %217 = vmatpush.msra.mxu3 %v900_v56  ;;  %200 = vmatpush.msra.mxu2 %v824_v18 }
  0x3c   : > { %178 = vmatpush.msra.mxu1 %v894_v53  ;;  %161 = vmatpush.msra.mxu0 %v1138_v15 }
  0x3d   : > { %218 = vmatpush.msra.mxu3 %v896_v54  ;;  %201 = vmatpush.msra.mxu2 %v1139_v16 }
  0x3e   : > { %179 = vmatpush.msra.mxu1 %v890_v51  ;;  %162 = vmatpush.msra.mxu0 %v1140_v13 }
  0x3f   : > { %219 = vmatpush.msra.mxu3 %v892_v52  ;;  %202 = vmatpush.msra.mxu2 %v1141_v14 }
  0x40   : > { %180 = vmatpush.msra.mxu1 %v886_v49  ;;  %163 = vmatpush.msra.mxu0 %v1142_v11  ;;  %v145_v11 = vadd.f32 %v143_v3, %v141_v2 }
  0x41   : > { %220 = vmatpush.msra.mxu3 %v888_v50  ;;  %203 = vmatpush.msra.mxu2 %v1143_v12 }
  0x42   : > { %181 = vmatpush.msra.mxu1 %v882_v47  ;;  %164 = vmatpush.msra.mxu0 %v1144_v9  ;;  %v1150_v9 = vld [vmem:[#allocation23_spill] sm:$0xff]  ;;  %669 = vtanh.f32 %v145_v11 }
  0x43   : > { %221 = vmatpush.msra.mxu3 %v884_v48  ;;  %204 = vmatpush.msra.mxu2 %v1145_v10  ;;  %v668_v10 = vpop.eup %667 }
  0x44   : > { %182 = vmatpush.msra.mxu1 %v878_v45  ;;  %165 = vmatpush.msra.mxu0 %v1146_v7 }
  0x45   : > { %222 = vmatpush.msra.mxu3 %v880_v46  ;;  %205 = vmatpush.msra.mxu2 %v1147_v8  ;;  %v148_v8 = vperm.slane %v926_v38, 1 }
  0x46   : > { %183 = vmatpush.msra.mxu1 %v874_v43  ;;  %166 = vmatpush.msra.mxu0 %v1148_v5 }
  0x47   : > { %223 = vmatpush.msra.mxu3 %v876_v44  ;;  %167 = vmatmul.f32.vlgmr.msra.gmra.mxu0 %v144_v4 }
  0x48   : > { %184 = vmatpush.msra.mxu1 %v870_v41  ;;  %206 = vmatpush.msra.mxu2 %v1149_v6  ;;  %v670_v15 = vpop.eup %669 }
  0x49   : > { %224 = vmatpush.msra.mxu3 %v872_v42  ;;  %207 = vmatmul.f32.vlgmr.msra.gmra.mxu2 %v144_v4 }
  0x4a   : > { %185 = vmatpush.msra.mxu1 %v866_v39 }
  0x4b   : > { %225 = vmatpush.msra.mxu3 %v868_v40 }
  0x4c   : > { %186 = vmatpush.msra.mxu1 %v862_v37 }
  0x4d   : > { %187 = vmatmul.f32.vlgmr.msra.gmra.mxu1 %v145_v11  ;;  %226 = vmatpush.msra.mxu3 %v1150_v9 }
  0x4e   : > { %227 = vmatmul.f32.vlgmr.msra.gmra.mxu3 %v145_v11 }
  0xc4   : > { %v168_v1 = vpop.f32.mrf.mxu0 }
  0xc5   : > { %v169_v2 = vadd.f32 %v168_v1, %v147_v0 }
  0xca   : > { %v188_v3 = vpop.f32.mrf.mxu1 }
  0xcb   : > { %v189_v7 = vadd.f32 %v188_v3, %v169_v2 }
  0xcc   : > { %v208_v12 = vpop.f32.mrf.mxu2 }
  0xcd   : > { %v231_v5 = vmax.f32 %v189_v7, 0.0  ;;  %v209_v13 = vadd.f32 %v208_v12, %v148_v8 }
  0xcf   : > { %250 = vmatpush.xpose.msrb.mxu1 %v231_v5 }
  0xd1   : > { %v228_v6 = vpop.f32.mrf.mxu3 }
  0xd2   : > { %v229_v14 = vadd.f32 %v228_v6, %v209_v13  ;;  %251 = vmatmul.f32.vlgmr.msrb.gmra.mxu1 %v668_v10 }
  0xd4   : > { %v232_v9 = vmax.f32 %v229_v14, 0.0 }
  0xd6   : > { %270 = vmatpush.xpose.msra.mxu1 %v232_v9 }
  0xda   : > { %271 = vmatmul.f32.vlgmr.msra.gmra.mxu1 %v670_v15 }
 0x14f   : > { %v252_v16 = vpop.f32.mrf.mxu1 }
 0x157   : > { %v272_v0 = vpop.f32.mrf.mxu1 }
 0x158   : > { %v273_v1 = vadd.f32 %v272_v0, %v252_v16 }
 0x15a   : > { %v276_v2 = vsel %vm275_vm1, %v273_v1, -inf }
 0x15b   : > { %277 = vmax.xlane.f32.xlu0 %v276_v2 }
 0x184   : > { %288 = vxpose.xlu0.b32.start.end [1/1] (short) %v144_v4, 128  ;;  %v1151_v4 = vld [vmem:[#allocation9_spill] sm:$0xff] }
 0x1ce   : > { %v278_v7 = vpop.xlane.xlu0 %277 }
 0x1cf   : > { %v279_v5 = vsub.f32 %v273_v1, %v278_v7 }
 0x1d1   : > { %v280_v3 = vmul.f32 1.442695, %v279_v5 }
 0x1d3   : > { %671 = vpow2.f32 %v280_v3 }
 0x1d9   : > { %v672_v8 = vpop.eup %671 }
 0x1da   : > { %v282_v6 = vsel %vm275_vm1, %v672_v8, 0.0 }
 0x1db   : > { %283 = vadd.xlane.f32.xlu1 %v282_v6 }
 0x215   : > { %320 = vxpose.xlu1.b32.start.end [1/1] (short) %v145_v11, 128 }
 0x228   : > { %v304_v10 = vpop.trf.xlu0 }
 0x230   : > { %v305_v12 = vpop.trf.xlu0 }
 0x238   : > { %v306_v13 = vpop.trf.xlu0 }
 0x240   : > { %v307_v14 = vpop.trf.xlu0 }
 0x248   : > { %v308_v15 = vpop.trf.xlu0 }
 0x24e   : > { %v284_v9 = vpop.xlane.xlu1 %283 }
 0x24f   : > { %673 = vrcp.f32 %v284_v9 }
 0x250   : > { %v309_v16 = vpop.trf.xlu0 }
 0x255   : > { %v674_v0 = vpop.eup %673 }
 0x256   : > { %v286_v2 = vmul.f32 %v674_v0, %v672_v8 }
 0x258   : > { %v287_v17 = vadd.f32 %v1151_v4, %v286_v2  ;;  %v310_v1 = vpop.trf.xlu0 }
 0x25a   : > { %463 = vmatpush.msrb.mxu0 %v287_v17  ;;  %647 = vmatpush.msrb.mxu1 %v287_v17 }
 0x25b   : > { %648 = vmatpush.msrb.mxu2 %v287_v17  ;;  %649 = vmatpush.msrb.mxu3 %v287_v17 }
 0x25c   : > { %613 = vmatmul.msk.f32.vlgmr.msrb.gmra.mxu0 %vm275_vm1, %v304_v10 }
 0x260   : > { %v311_v11 = vpop.trf.xlu0 }
 0x264   : > { %614 = vmatmul.msk.f32.gmra.mxu0 %vm275_vm1, %v305_v12 }
 0x268   : > { %v312_v7 = vpop.trf.xlu0 }
 0x269   : > { %621 = vmatmul.msk.f32.vlgmr.msrb.gmra.mxu1 %vm275_vm1, %v312_v7 }
 0x26c   : > { %615 = vmatmul.msk.f32.gmra.mxu0 %vm275_vm1, %v306_v13 }
 0x270   : > { %v313_v5 = vpop.trf.xlu0 }
 0x271   : > { %622 = vmatmul.msk.f32.gmra.mxu1 %vm275_vm1, %v313_v5 }
 0x274   : > { %616 = vmatmul.msk.f32.gmra.mxu0 %vm275_vm1, %v307_v14 }
 0x278   : > { %v314_v3 = vpop.trf.xlu0 }
 0x279   : > { %623 = vmatmul.msk.f32.gmra.mxu1 %vm275_vm1, %v314_v3 }
 0x27c   : > { %617 = vmatmul.msk.f32.gmra.mxu0 %vm275_vm1, %v308_v15 }
 0x280   : > { %v315_v17 = vpop.trf.xlu0 }
 0x281   : > { %624 = vmatmul.msk.f32.gmra.mxu1 %vm275_vm1, %v315_v17 }
 0x284   : > { %618 = vmatmul.msk.f32.gmra.mxu0 %vm275_vm1, %v309_v16 }
 0x288   : > { %v316_v8 = vpop.trf.xlu0 }
 0x289   : > { %625 = vmatmul.msk.f32.gmra.mxu1 %vm275_vm1, %v316_v8 }
 0x28c   : > { %619 = vmatmul.msk.f32.gmra.mxu0 %vm275_vm1, %v310_v1 }
 0x290   : > { %v317_v6 = vpop.trf.xlu0 }
 0x291   : > { %626 = vmatmul.msk.f32.gmra.mxu1 %vm275_vm1, %v317_v6 }
 0x294   : > { %620 = vmatmul.msk.f32.gmra.mxu0 %vm275_vm1, %v311_v11 }
 0x298   : > { %v318_v10 = vpop.trf.xlu0 }
 0x299   : > { %627 = vmatmul.msk.f32.vlgmr.msrb.gmra.mxu2 %vm275_vm1, %v318_v10 }
 0x2a0   : > { %v319_v12 = vpop.trf.xlu0 }
 0x2a1   : > { %628 = vmatmul.msk.f32.gmra.mxu2 %vm275_vm1, %v319_v12 }
 0x2b9   : > { %v336_v13 = vpop.trf.xlu1 }
 0x2ba   : > { %629 = vmatmul.msk.f32.gmra.mxu2 %vm275_vm1, %v336_v13 }
 0x2c1   : > { %v337_v14 = vpop.trf.xlu1 }
 0x2c2   : > { %630 = vmatmul.msk.f32.gmra.mxu2 %vm275_vm1, %v337_v14 }
 0x2c9   : > { %v338_v15 = vpop.trf.xlu1 }
 0x2ca   : > { %631 = vmatmul.msk.f32.gmra.mxu2 %vm275_vm1, %v338_v15 }
 0x2d1   : > { %v339_v9 = vpop.trf.xlu1 }
 0x2d2   : > { %632 = vmatmul.msk.f32.gmra.mxu2 %vm275_vm1, %v339_v9 }
 0x2d9   : > { %v340_v16 = vpop.trf.xlu1  ;;  %v465_v0 = vpop.f32.mrf.mxu0 }
 0x2da   : > { %633 = vmatmul.msk.f32.gmra.mxu2 %vm275_vm1, %v340_v16  ;;  %563 = vst.msk [vmem:[%s1027_s7] sm:$0xff] %vm275_vm1, %v465_v0 }
 0x2e1   : > { %v341_v2 = vpop.trf.xlu1  ;;  %v468_v4 = vpop.f32.mrf.mxu0 }
 0x2e2   : > { %634 = vmatmul.msk.f32.gmra.mxu2 %vm275_vm1, %v341_v2  ;;  %564 = vst.msk [vmem:[%s1027_s7 + $0x8] sm:$0xff] %vm275_vm1, %v468_v4 }
 0x2e6   : > { %v489_v16 = vpop.f32.mrf.mxu1 }
 0x2e7   : > { %571 = vst.msk [vmem:[%s1027_s7 + $0x40] sm:$0xff] %vm275_vm1, %v489_v16 }
 0x2e9   : > { %v342_v1 = vpop.trf.xlu1  ;;  %v471_v11 = vpop.f32.mrf.mxu0 }
 0x2ea   : > { %635 = vmatmul.msk.f32.gmra.mxu2 %vm275_vm1, %v342_v1  ;;  %565 = vst.msk [vmem:[%s1027_s7 + $0x10] sm:$0xff] %vm275_vm1, %v471_v11 }
 0x2ee   : > { %v492_v4 = vpop.f32.mrf.mxu1 }
 0x2ef   : > { %572 = vst.msk [vmem:[%s1027_s7 + $0x48] sm:$0xff] %vm275_vm1, %v492_v4 }
 0x2f1   : > { %v343_v7 = vpop.trf.xlu1  ;;  %v474_v5 = vpop.f32.mrf.mxu0 }
 0x2f2   : > { %636 = vmatmul.msk.f32.vlgmr.msrb.gmra.mxu3 %vm275_vm1, %v343_v7  ;;  %566 = vst.msk [vmem:[%s1027_s7 + $0x18] sm:$0xff] %vm275_vm1, %v474_v5 }
 0x2f6   : > { %v495_v11 = vpop.f32.mrf.mxu1 }
 0x2f7   : > { %573 = vst.msk [vmem:[%s1027_s7 + $0x50] sm:$0xff] %vm275_vm1, %v495_v11 }
 0x2f9   : > { %v344_v3 = vpop.trf.xlu1  ;;  %v477_v17 = vpop.f32.mrf.mxu0 }
 0x2fa   : > { %637 = vmatmul.msk.f32.gmra.mxu3 %vm275_vm1, %v344_v3  ;;  %567 = vst.msk [vmem:[%s1027_s7 + $0x20] sm:$0xff] %vm275_vm1, %v477_v17 }
 0x2fe   : > { %v498_v5 = vpop.f32.mrf.mxu1 }
 0x2ff   : > { %574 = vst.msk [vmem:[%s1027_s7 + $0x58] sm:$0xff] %vm275_vm1, %v498_v5 }
 0x301   : > { %v345_v8 = vpop.trf.xlu1  ;;  %v480_v6 = vpop.f32.mrf.mxu0 }
 0x302   : > { %638 = vmatmul.msk.f32.gmra.mxu3 %vm275_vm1, %v345_v8  ;;  %568 = vst.msk [vmem:[%s1027_s7 + $0x28] sm:$0xff] %vm275_vm1, %v480_v6 }
 0x306   : > { %v501_v17 = vpop.f32.mrf.mxu1 }
 0x307   : > { %575 = vst.msk [vmem:[%s1027_s7 + $0x60] sm:$0xff] %vm275_vm1, %v501_v17 }
 0x309   : > { %v346_v10 = vpop.trf.xlu1  ;;  %v483_v12 = vpop.f32.mrf.mxu0 }
 0x30a   : > { %639 = vmatmul.msk.f32.gmra.mxu3 %vm275_vm1, %v346_v10  ;;  %569 = vst.msk [vmem:[%s1027_s7 + $0x30] sm:$0xff] %vm275_vm1, %v483_v12 }
 0x30e   : > { %v504_v6 = vpop.f32.mrf.mxu1 }
 0x30f   : > { %576 = vst.msk [vmem:[%s1027_s7 + $0x68] sm:$0xff] %vm275_vm1, %v504_v6 }
 0x311   : > { %v347_v13 = vpop.trf.xlu1  ;;  %v486_v14 = vpop.f32.mrf.mxu0 }
 0x312   : > { %640 = vmatmul.msk.f32.gmra.mxu3 %vm275_vm1, %v347_v13  ;;  %570 = vst.msk [vmem:[%s1027_s7 + $0x38] sm:$0xff] %vm275_vm1, %v486_v14 }
 0x319   : > { %v348_v15 = vpop.trf.xlu1 }
 0x31a   : > { %641 = vmatmul.msk.f32.gmra.mxu3 %vm275_vm1, %v348_v15 }
 0x31c   : > { %v507_v9 = vpop.f32.mrf.mxu2 }
 0x31d   : > { %577 = vst.msk [vmem:[%s1027_s7 + $0x70] sm:$0xff] %vm275_vm1, %v507_v9 }
 0x321   : > { %v349_v0 = vpop.trf.xlu1 }
 0x322   : > { %642 = vmatmul.msk.f32.gmra.mxu3 %vm275_vm1, %v349_v0 }
 0x324   : > { %v510_v2 = vpop.f32.mrf.mxu2 }
 0x325   : > { %578 = vst.msk [vmem:[%s1027_s7 + $0x78] sm:$0xff] %vm275_vm1, %v510_v2 }
 0x329   : > { %v350_v1 = vpop.trf.xlu1 }
 0x32a   : > { %643 = vmatmul.msk.f32.gmra.mxu3 %vm275_vm1, %v350_v1 }
 0x331   : > { %v351_v7 = vpop.trf.xlu1 }
 0x332   : > { %644 = vmatmul.msk.f32.gmra.mxu3 %vm275_vm1, %v351_v7 }
 0x33d   : > { %v513_v3 = vpop.f32.mrf.mxu2 }
 0x33e   : > { %579 = vst.msk [vmem:[%s1027_s7 + $0x80] sm:$0xff] %vm275_vm1, %v513_v3 }
 0x345   : > { %v516_v8 = vpop.f32.mrf.mxu2 }
 0x346   : > { %580 = vst.msk [vmem:[%s1027_s7 + $0x88] sm:$0xff] %vm275_vm1, %v516_v8 }
 0x34d   : > { %v519_v10 = vpop.f32.mrf.mxu2 }
 0x34e   : > { %581 = vst.msk [vmem:[%s1027_s7 + $0x90] sm:$0xff] %vm275_vm1, %v519_v10 }
 0x355   : > { %v522_v12 = vpop.f32.mrf.mxu2 }
 0x356   : > { %582 = vst.msk [vmem:[%s1027_s7 + $0x98] sm:$0xff] %vm275_vm1, %v522_v12 }
 0x35d   : > { %v525_v13 = vpop.f32.mrf.mxu2 }
 0x35e   : > { %583 = vst.msk [vmem:[%s1027_s7 + $0xa0] sm:$0xff] %vm275_vm1, %v525_v13 }
 0x365   : > { %v528_v14 = vpop.f32.mrf.mxu2 }
 0x366   : > { %584 = vst.msk [vmem:[%s1027_s7 + $0xa8] sm:$0xff] %vm275_vm1, %v528_v14 }
 0x36d   : > { %v531_v15 = vpop.f32.mrf.mxu2 }
 0x36e   : > { %585 = vst.msk [vmem:[%s1027_s7 + $0xb0] sm:$0xff] %vm275_vm1, %v531_v15 }
 0x375   : > { %v534_v9 = vpop.f32.mrf.mxu3 }
 0x376   : > { %586 = vst.msk [vmem:[%s1027_s7 + $0xb8] sm:$0xff] %vm275_vm1, %v534_v9 }
 0x37d   : > { %v537_v16 = vpop.f32.mrf.mxu3 }
 0x37e   : > { %587 = vst.msk [vmem:[%s1027_s7 + $0xc0] sm:$0xff] %vm275_vm1, %v537_v16 }
 0x385   : > { %v540_v0 = vpop.f32.mrf.mxu3 }
 0x386   : > { %588 = vst.msk [vmem:[%s1027_s7 + $0xc8] sm:$0xff] %vm275_vm1, %v540_v0 }
 0x38d   : > { %v543_v2 = vpop.f32.mrf.mxu3 }
 0x38e   : > { %589 = vst.msk [vmem:[%s1027_s7 + $0xd0] sm:$0xff] %vm275_vm1, %v543_v2 }
 0x395   : > { %v546_v4 = vpop.f32.mrf.mxu3 }
 0x396   : > { %590 = vst.msk [vmem:[%s1027_s7 + $0xd8] sm:$0xff] %vm275_vm1, %v546_v4 }
 0x39d   : > { %v549_v1 = vpop.f32.mrf.mxu3 }
 0x39e   : > { %591 = vst.msk [vmem:[%s1027_s7 + $0xe0] sm:$0xff] %vm275_vm1, %v549_v1 }
 0x3a5   : > { %v552_v11 = vpop.f32.mrf.mxu3 }
 0x3a6   : > { %592 = vst.msk [vmem:[%s1027_s7 + $0xe8] sm:$0xff] %vm275_vm1, %v552_v11 }
 0x3ad   : > { %v555_v7 = vpop.f32.mrf.mxu3 }
 0x3ae   : > { %593 = vst.msk [vmem:[%s1027_s7 + $0xf0] sm:$0xff] %vm275_vm1, %v555_v7 }
 0x3b2   :  { %135 = sbr.rel (!%p133_p0) target bundleno = 40 (0x28), region = 53 }
 0x3b5   : > { %v558_v5 = vpop.f32.mrf.mxu3 }
 0x3b6   : > { %594 = vst.msk [vmem:[%s1027_s7 + $0xf8] sm:$0xff] %vm275_vm1, %v558_v5 }
 0x3b7   :  { %599 = vsyncpa [#allocation3], 1 }
 0x3b8   :  { %600 = vsyncpa [#allocation5], 1 }

</bundles_post_ra>
